<compile_context>
chip_gen: v7x
topology: tpu7x:2x2x1
jax: 0.10.0
libtpu: 0.0.40
codegen_flags: <defaults>
</compile_context>

<pallas_src>
import functools

import jax
import jax.numpy as jnp
from jax import lax
from jax.experimental import pallas as pl
from jax.experimental.pallas import tpu as pltpu

_BIG = 1e30  # "infinite" squared distance for padded target columns


def _pose_loss_kernel(sym_ref, r_ref, t_ref, mp_ref, tg_ref, out_ref,
                      row_ref, d2_ref, pm_ref, bt_ref, *, tk, n_chunks):
    g = pl.program_id(0)        # batch block
    bi = pl.program_id(1)       # element within the block ("arbitrary" axis)
    b_tile = d2_ref.shape[0]
    n = d2_ref.shape[1]
    b = g * b_tile + bi         # global batch index (for SMEM lookups)

    mp = mp_ref[0]              # (3, N) model points, points on lanes
    tg = tg_ref[0]              # (3, N) target points
    mx, my, mz = mp[0:1, :], mp[1:2, :], mp[2:3, :]
    tx, ty, tz = tg[0:1, :], tg[1:2, :], tg[2:3, :]

    # Rigid transform on the VPU via SMEM scalar broadcasts (no MXU, no extra
    # VMEM streams).  pred (column form) = R @ mp + t.
    px = r_ref[b, 0] * mx + r_ref[b, 1] * my + r_ref[b, 2] * mz + t_ref[b, 0]
    py = r_ref[b, 3] * mx + r_ref[b, 4] * my + r_ref[b, 5] * mz + t_ref[b, 1]
    pz = r_ref[b, 6] * mx + r_ref[b, 7] * my + r_ref[b, 8] * mz + t_ref[b, 2]

    is_sym = sym_ref[b] > 0

    # ---- direct branch: ADD (per-point distance to the matching target) ----
    @pl.when(jnp.logical_not(is_sym))
    def _():
        dx = px - tx
        dy = py - ty
        dz = pz - tz
        row_ref[...] = dx * dx + dy * dy + dz * dz              # (1, N)

    # ---- symmetric branch: ADD-S (min over all pairwise distances) ---------
    @pl.when(is_sym)
    def _():
        # pred-side matrix (8, N): rows 0..2 = pred, 3 = |pred|^2, 4 = 1, 5..7 = 0
        pm_ref[0:1, :] = px
        pm_ref[1:2, :] = py
        pm_ref[2:3, :] = pz
        pm_ref[3:4, :] = px * px + py * py + pz * pz
        pm_ref[4:5, :] = jnp.ones_like(px)
        pm_ref[5:8, :] = jnp.zeros((3, n), jnp.float32)

        # target-side matrix (8, n_tk_pad): rows 0..2 = -2*tgt, 3 = 1, 4 = |tgt|^2.
        # Padded target columns keep |tgt|^2 = _BIG so they never win the min.
        n_tk_pad = bt_ref.shape[1]
        bt_ref[...] = jnp.zeros_like(bt_ref)
        bt_ref[0:1, 0:n] = -2.0 * tx
        bt_ref[1:2, 0:n] = -2.0 * ty
        bt_ref[2:3, 0:n] = -2.0 * tz
        bt_ref[3:4, 0:n] = jnp.ones_like(tx)
        bt_ref[4:5, :] = jnp.full((1, n_tk_pad), _BIG, jnp.float32)
        bt_ref[4:5, 0:n] = tx * tx + ty * ty + tz * tz

        # d2[j, i] = |tgt_j|^2 + |pred_i|^2 - 2 tgt_j . pred_i, contracted over
        # the coordinate (sublane) axis.  Chunked over targets with a running
        # min so the live intermediate is only (tk, N).
        if n_chunks == 1:
            d2_pair = lax.dot_general(
                bt_ref[...], pm_ref[...], (((0,), (0,)), ((), ())),
                preferred_element_type=jnp.float32)              # (n_tk_pad, N)
            row_ref[...] = jnp.min(d2_pair, axis=0, keepdims=True)
        else:
            row_ref[...] = jnp.full((1, n), jnp.inf, jnp.float32)

            @pl.loop(0, n_chunks)
            def _(c):
                j0 = pl.multiple_of(c * tk, tk)
                btc = bt_ref[:, pl.ds(j0, tk)]                   # (8, tk)
                d2_pair = lax.dot_general(
                    btc, pm_ref[...], (((0,), (0,)), ((), ())),
                    preferred_element_type=jnp.float32)          # (tk, N)
                row_ref[...] = jnp.minimum(
                    row_ref[...], jnp.min(d2_pair, axis=0, keepdims=True))

    # Scatter this element's per-point d^2 into its row of the dense scratch
    # (iota-mask select: no dynamic-sublane stores needed).
    if b_tile == 1:
        d2_ref[...] = row_ref[...]
    else:
        rowsel = lax.broadcasted_iota(jnp.int32, (b_tile, n), 0) == bi
        d2_ref[...] = jnp.where(rowsel, row_ref[...], d2_ref[...])

    # Dense epilogue once per b_tile elements: one clamp/sqrt/lane-sum pass
    # over the (b_tile, N) block and a single (b_tile, 1) output store.
    @pl.when(bi == b_tile - 1)
    def _():
        d = jnp.sqrt(jnp.maximum(d2_ref[...], 0.0))              # (b_tile, N)
        out_ref[0] = jnp.sum(d, axis=1, keepdims=True) * (1.0 / n)


def pose_loss(pred_r, pred_t, targets, model_points, idxs, sym_list,
              *, b_tile=8, tk=256):
    """JAX/Pallas equivalent of PoseLoss.forward (ADD for asymmetric classes,
    ADD-S for symmetric classes)."""
    f32 = jnp.float32
    bs, n, _ = model_points.shape

    # v7x megacore: keep >= 2 blocks on the parallel batch axis.
    b_tile = int(max(1, min(b_tile, pl.cdiv(bs, 2))))
    n_blocks = int(pl.cdiv(bs, b_tile))
    bs_pad = n_blocks * b_tile
    pad_b = bs_pad - bs

    # Target-chunk width for the ADD-S pairwise matmul (multiple of 128 lanes;
    # 256 matches the v6e/v7x MXU, pass tk=128 for v5e).
    tk = int(max(128, min(tk, pl.cdiv(n, 128) * 128)))
    n_tk_pad = int(pl.cdiv(n, tk) * tk)
    n_chunks = n_tk_pad // tk

    # Lane-dense streams: coords on sublanes (3, no zero padding), points on lanes.
    mpT = jnp.pad(jnp.transpose(model_points.astype(f32), (0, 2, 1)),
                  ((0, pad_b), (0, 0), (0, 0)))                  # (bs_pad, 3, N)
    tgT = jnp.pad(jnp.transpose(targets.astype(f32), (0, 2, 1)),
                  ((0, pad_b), (0, 0), (0, 0)))                  # (bs_pad, 3, N)

    # Per-batch rotation / translation as SMEM scalars.
    r_flat = jnp.pad(pred_r.astype(f32).reshape(bs, 9), ((0, pad_b), (0, 0)))
    t_flat = jnp.pad(pred_t.astype(f32).reshape(bs, 3), ((0, pad_b), (0, 0)))

    sym = jnp.isin(idxs.reshape(-1),
                   jnp.asarray(sym_list, jnp.int32)).astype(jnp.int32)
    sym = jnp.pad(sym, (0, pad_b))                               # (bs_pad,)

    kernel = functools.partial(_pose_loss_kernel, tk=tk, n_chunks=n_chunks)

    per_batch = pl.pallas_call(
        kernel,
        out_shape=jax.ShapeDtypeStruct((n_blocks, b_tile, 1), f32),
        grid_spec=pltpu.PrefetchScalarGridSpec(
            num_scalar_prefetch=1,
            grid=(n_blocks, b_tile),
            in_specs=[
                pl.BlockSpec(memory_space=pltpu.MemorySpace.SMEM),  # pred_r (flat)
                pl.BlockSpec(memory_space=pltpu.MemorySpace.SMEM),  # pred_t (flat)
                pl.BlockSpec((1, 3, n), lambda g, bi, s: (g * b_tile + bi, 0, 0)),
                pl.BlockSpec((1, 3, n), lambda g, bi, s: (g * b_tile + bi, 0, 0)),
            ],
            out_specs=pl.BlockSpec((1, b_tile, 1), lambda g, bi, s: (g, 0, 0)),
            scratch_shapes=[
                pltpu.VMEM((1, n), f32),          # current element's per-point d^2
                pltpu.VMEM((b_tile, n), f32),     # dense per-block d^2 accumulator
                pltpu.VMEM((8, n), f32),          # ADD-S pred-side matrix
                pltpu.VMEM((8, n_tk_pad), f32),   # ADD-S target-side matrix
            ],
        ),
        compiler_params=pltpu.CompilerParams(
            dimension_semantics=("parallel", "arbitrary")),
    )(sym, r_flat, t_flat, mpT, tgT)

    per_batch = per_batch.reshape(-1)[:bs]        # drop batch padding
    return jnp.mean(per_batch)                    # final batch mean (glue)


def pose_loss_ref(pred_r, pred_t, targets, model_points, idxs, sym_list):
    """Pure-JAX reference matching the PyTorch semantics."""
    pred = jnp.einsum('bnk,bjk->bnj', model_points, pred_r) + pred_t
    sym = jnp.isin(idxs.reshape(-1), jnp.asarray(sym_list, jnp.int32))
    d_direct = jnp.linalg.norm(pred - targets, axis=2)                  # (bs,N)
    d2 = jnp.sum((pred[:, :, None, :] - targets[:, None, :, :]) ** 2, axis=-1)
    d_min = jnp.sqrt(jnp.min(d2, axis=2))                               # (bs,N)
    d = jnp.where(sym[:, None], d_min, d_direct)
    return jnp.mean(jnp.mean(d, axis=1))


if __name__ == "__main__":
    key = jax.random.PRNGKey(0)

    def make_inputs(k, bs, n):
        k1, k2, k3, k4 = jax.random.split(k, 4)
        pred_r = jax.random.normal(k1, (bs, 3, 3), jnp.float32)
        pred_t = jax.random.normal(k2, (bs, 1, 3), jnp.float32) * 0.1
        model_points = jax.random.normal(k3, (bs, n, 3), jnp.float32)
        targets = jax.random.normal(k4, (bs, n, 3), jnp.float32)
        return pred_r, pred_t, targets, model_points

    cases = [
        # (bs, n, idxs, sym_list, tk)
        (2, 128, jnp.array([0, 1], jnp.int32), [1, 5], 256),     # one chunk
        (3, 384, jnp.array([2, 0, 5], jnp.int32), [2, 5], 128),  # 3 target chunks + batch pad
        (2, 200, jnp.array([7, 3], jnp.int32), [3], 256),        # non-aligned N + padded target cols
    ]

    keys = jax.random.split(key, len(cases))
    for case_key, (bs, n, idxs, sym_list, tk) in zip(keys, cases):
        pred_r, pred_t, targets, model_points = make_inputs(case_key, bs, n)
        out = pose_loss(pred_r, pred_t, targets, model_points, idxs, sym_list,
                        tk=tk)
        out = jax.block_until_ready(out)
        ref = pose_loss_ref(pred_r, pred_t, targets, model_points, idxs,
                            sym_list)
        assert jnp.allclose(out, ref, rtol=1e-3, atol=1e-3), (bs, n, out, ref)

    print("KERNEL_OK")
</pallas_src>

<mosaic_0001>
module attributes {stable_mosaic.version = 11 : i64} {
  func.func @_pose_loss_kernel(%arg0: i32, %arg1: i32, %arg2: memref<2xi32, #tpu.memory_space<smem>>, %arg3: memref<2x9xf32, #tpu.memory_space<smem>>, %arg4: memref<2x3xf32, #tpu.memory_space<smem>>, %arg5: memref<1x3x128xf32, #tpu.memory_space<vmem>>, %arg6: memref<1x3x128xf32, #tpu.memory_space<vmem>>, %arg7: memref<1x1x1xf32, #tpu.memory_space<vmem>>, %arg8: memref<1x128xf32, #tpu.memory_space<vmem>>, %arg9: memref<1x128xf32, #tpu.memory_space<vmem>>, %arg10: memref<8x128xf32, #tpu.memory_space<vmem>>, %arg11: memref<8x128xf32, #tpu.memory_space<vmem>>) attributes {dimension_semantics = [#tpu.dimension_semantics<parallel>, #tpu.dimension_semantics<arbitrary>], iteration_bounds = array<i64: 2, 1>, scalar_prefetch = 1 : i64, scratch_operands = 4 : i64, tpu.core_type = #tpu.core_type<tc>, window_params = [{transform_indices = @transform_0, window_bounds = array<i64: 2, 9>}, {transform_indices = @transform_1, window_bounds = array<i64: 2, 3>}, {transform_indices = @transform_2, window_bounds = array<i64: 1, 3, 128>}, {transform_indices = @transform_3, window_bounds = array<i64: 1, 3, 128>}, {transform_indices = @transform_4, window_bounds = array<i64: 1, 1, 1>}]} {
    %c1_i32 = arith.constant 1 : i32
    %0 = arith.muli %arg0, %c1_i32 : i32
    %1 = arith.addi %0, %arg1 : i32
    %c0 = arith.constant 0 : index
    %c0_0 = arith.constant 0 : index
    %c0_1 = arith.constant 0 : index
    %2 = vector.load %arg5[%c0, %c0_0, %c0_1] : memref<1x3x128xf32, #tpu.memory_space<vmem>>, vector<1x3x128xf32>
    %3 = vector.shape_cast %2 : vector<1x3x128xf32> to vector<3x128xf32>
    %c0_2 = arith.constant 0 : index
    %c0_3 = arith.constant 0 : index
    %c0_4 = arith.constant 0 : index
    %4 = vector.load %arg6[%c0_2, %c0_3, %c0_4] : memref<1x3x128xf32, #tpu.memory_space<vmem>>, vector<1x3x128xf32>
    %5 = vector.shape_cast %4 : vector<1x3x128xf32> to vector<3x128xf32>
    %6 = vector.extract_strided_slice %3 {offsets = [0, 0], sizes = [1, 128], strides = [1, 1]} : vector<3x128xf32> to vector<1x128xf32>
    %7 = vector.extract_strided_slice %3 {offsets = [1, 0], sizes = [1, 128], strides = [1, 1]} : vector<3x128xf32> to vector<1x128xf32>
    %8 = vector.extract_strided_slice %3 {offsets = [2, 0], sizes = [1, 128], strides = [1, 1]} : vector<3x128xf32> to vector<1x128xf32>
    %9 = vector.extract_strided_slice %5 {offsets = [0, 0], sizes = [1, 128], strides = [1, 1]} : vector<3x128xf32> to vector<1x128xf32>
    %10 = vector.extract_strided_slice %5 {offsets = [1, 0], sizes = [1, 128], strides = [1, 1]} : vector<3x128xf32> to vector<1x128xf32>
    %11 = vector.extract_strided_slice %5 {offsets = [2, 0], sizes = [1, 128], strides = [1, 1]} : vector<3x128xf32> to vector<1x128xf32>
    %12 = arith.index_cast %1 : i32 to index
    %c0_5 = arith.constant 0 : index
    %13 = memref.load %arg3[%12, %c0_5] : memref<2x9xf32, #tpu.memory_space<smem>>
    %14 = vector.broadcast %13 : f32 to vector<1x128xf32>
    %15 = arith.mulf %14, %6 : vector<1x128xf32>
    %16 = arith.index_cast %1 : i32 to index
    %c1 = arith.constant 1 : index
    %17 = memref.load %arg3[%16, %c1] : memref<2x9xf32, #tpu.memory_space<smem>>
    %18 = vector.broadcast %17 : f32 to vector<1x128xf32>
    %19 = arith.mulf %18, %7 : vector<1x128xf32>
    %20 = arith.addf %15, %19 : vector<1x128xf32>
    %21 = arith.index_cast %1 : i32 to index
    %c2 = arith.constant 2 : index
    %22 = memref.load %arg3[%21, %c2] : memref<2x9xf32, #tpu.memory_space<smem>>
    %23 = vector.broadcast %22 : f32 to vector<1x128xf32>
    %24 = arith.mulf %23, %8 : vector<1x128xf32>
    %25 = arith.addf %20, %24 : vector<1x128xf32>
    %26 = arith.index_cast %1 : i32 to index
    %c0_6 = arith.constant 0 : index
    %27 = memref.load %arg4[%26, %c0_6] : memref<2x3xf32, #tpu.memory_space<smem>>
    %28 = vector.broadcast %27 : f32 to vector<1x128xf32>
    %29 = arith.addf %25, %28 : vector<1x128xf32>
    %30 = arith.index_cast %1 : i32 to index
    %c3 = arith.constant 3 : index
    %31 = memref.load %arg3[%30, %c3] : memref<2x9xf32, #tpu.memory_space<smem>>
    %32 = vector.broadcast %31 : f32 to vector<1x128xf32>
    %33 = arith.mulf %32, %6 : vector<1x128xf32>
    %34 = arith.index_cast %1 : i32 to index
    %c4 = arith.constant 4 : index
    %35 = memref.load %arg3[%34, %c4] : memref<2x9xf32, #tpu.memory_space<smem>>
    %36 = vector.broadcast %35 : f32 to vector<1x128xf32>
    %37 = arith.mulf %36, %7 : vector<1x128xf32>
    %38 = arith.addf %33, %37 : vector<1x128xf32>
    %39 = arith.index_cast %1 : i32 to index
    %c5 = arith.constant 5 : index
    %40 = memref.load %arg3[%39, %c5] : memref<2x9xf32, #tpu.memory_space<smem>>
    %41 = vector.broadcast %40 : f32 to vector<1x128xf32>
    %42 = arith.mulf %41, %8 : vector<1x128xf32>
    %43 = arith.addf %38, %42 : vector<1x128xf32>
    %44 = arith.index_cast %1 : i32 to index
    %c1_7 = arith.constant 1 : index
    %45 = memref.load %arg4[%44, %c1_7] : memref<2x3xf32, #tpu.memory_space<smem>>
    %46 = vector.broadcast %45 : f32 to vector<1x128xf32>
    %47 = arith.addf %43, %46 : vector<1x128xf32>
    %48 = arith.index_cast %1 : i32 to index
    %c6 = arith.constant 6 : index
    %49 = memref.load %arg3[%48, %c6] : memref<2x9xf32, #tpu.memory_space<smem>>
    %50 = vector.broadcast %49 : f32 to vector<1x128xf32>
    %51 = arith.mulf %50, %6 : vector<1x128xf32>
    %52 = arith.index_cast %1 : i32 to index
    %c7 = arith.constant 7 : index
    %53 = memref.load %arg3[%52, %c7] : memref<2x9xf32, #tpu.memory_space<smem>>
    %54 = vector.broadcast %53 : f32 to vector<1x128xf32>
    %55 = arith.mulf %54, %7 : vector<1x128xf32>
    %56 = arith.addf %51, %55 : vector<1x128xf32>
    %57 = arith.index_cast %1 : i32 to index
    %c8 = arith.constant 8 : index
    %58 = memref.load %arg3[%57, %c8] : memref<2x9xf32, #tpu.memory_space<smem>>
    %59 = vector.broadcast %58 : f32 to vector<1x128xf32>
    %60 = arith.mulf %59, %8 : vector<1x128xf32>
    %61 = arith.addf %56, %60 : vector<1x128xf32>
    %62 = arith.index_cast %1 : i32 to index
    %c2_8 = arith.constant 2 : index
    %63 = memref.load %arg4[%62, %c2_8] : memref<2x3xf32, #tpu.memory_space<smem>>
    %64 = vector.broadcast %63 : f32 to vector<1x128xf32>
    %65 = arith.addf %61, %64 : vector<1x128xf32>
    %66 = arith.index_cast %1 : i32 to index
    %67 = memref.load %arg2[%66] : memref<2xi32, #tpu.memory_space<smem>>
    %c0_i32 = arith.constant 0 : i32
    %68 = arith.cmpi sgt, %67, %c0_i32 : i32
    %true = arith.constant true
    %69 = arith.xori %68, %true : i1
    %70 = arith.extui %69 : i1 to i32
    %c0_i32_9 = arith.constant 0 : i32
    %71 = arith.cmpi ne, %70, %c0_i32_9 : i32
    scf.if %71 {
      %79 = arith.subf %29, %9 : vector<1x128xf32>
      %80 = arith.subf %47, %10 : vector<1x128xf32>
      %81 = arith.subf %65, %11 : vector<1x128xf32>
      %82 = arith.mulf %79, %79 : vector<1x128xf32>
      %83 = arith.mulf %80, %80 : vector<1x128xf32>
      %84 = arith.addf %82, %83 : vector<1x128xf32>
      %85 = arith.mulf %81, %81 : vector<1x128xf32>
      %86 = arith.addf %84, %85 : vector<1x128xf32>
      %c0_17 = arith.constant 0 : index
      %c0_18 = arith.constant 0 : index
      %87 = vector.load %arg8[%c0_17, %c0_18] : memref<1x128xf32, #tpu.memory_space<vmem>>, vector<1x128xf32>
      tpu.vector_store %arg8[%c0_17, %c0_18], %86 {strides = array<i32>} : memref<1x128xf32, #tpu.memory_space<vmem>>, vector<1x128xf32>,
    } else {
    }
    %72 = arith.extui %68 : i1 to i32
    %c0_i32_10 = arith.constant 0 : i32
    %73 = arith.cmpi ne, %72, %c0_i32_10 : i32
    scf.if %73 {
      %c0_17 = arith.constant 0 : index
      %c0_18 = arith.constant 0 : index
      %79 = vector.load %arg10[%c0_17, %c0_18] : memref<8x128xf32, #tpu.memory_space<vmem>>, vector<1x128xf32>
      tpu.vector_store %arg10[%c0_17, %c0_18], %29 {strides = array<i32>} : memref<8x128xf32, #tpu.memory_space<vmem>>, vector<1x128xf32>,
      %c1_19 = arith.constant 1 : index
      %c0_20 = arith.constant 0 : index
      %80 = vector.load %arg10[%c1_19, %c0_20] : memref<8x128xf32, #tpu.memory_space<vmem>>, vector<1x128xf32>
      tpu.vector_store %arg10[%c1_19, %c0_20], %47 {strides = array<i32>} : memref<8x128xf32, #tpu.memory_space<vmem>>, vector<1x128xf32>,
      %c2_21 = arith.constant 2 : index
      %c0_22 = arith.constant 0 : index
      %81 = vector.load %arg10[%c2_21, %c0_22] : memref<8x128xf32, #tpu.memory_space<vmem>>, vector<1x128xf32>
      tpu.vector_store %arg10[%c2_21, %c0_22], %65 {strides = array<i32>} : memref<8x128xf32, #tpu.memory_space<vmem>>, vector<1x128xf32>,
      %82 = arith.mulf %29, %29 : vector<1x128xf32>
      %83 = arith.mulf %47, %47 : vector<1x128xf32>
      %84 = arith.addf %82, %83 : vector<1x128xf32>
      %85 = arith.mulf %65, %65 : vector<1x128xf32>
      %86 = arith.addf %84, %85 : vector<1x128xf32>
      %c3_23 = arith.constant 3 : index
      %c0_24 = arith.constant 0 : index
      %87 = vector.load %arg10[%c3_23, %c0_24] : memref<8x128xf32, #tpu.memory_space<vmem>>, vector<1x128xf32>
      tpu.vector_store %arg10[%c3_23, %c0_24], %86 {strides = array<i32>} : memref<8x128xf32, #tpu.memory_space<vmem>>, vector<1x128xf32>,
      %cst = arith.constant 1.000000e+00 : f32
      %88 = vector.broadcast %cst : f32 to vector<1x128xf32>
      %c4_25 = arith.constant 4 : index
      %c0_26 = arith.constant 0 : index
      %89 = vector.load %arg10[%c4_25, %c0_26] : memref<8x128xf32, #tpu.memory_space<vmem>>, vector<1x128xf32>
      tpu.vector_store %arg10[%c4_25, %c0_26], %88 {strides = array<i32>} : memref<8x128xf32, #tpu.memory_space<vmem>>, vector<1x128xf32>,
      %cst_27 = arith.constant 0.000000e+00 : f32
      %90 = vector.broadcast %cst_27 : f32 to vector<3x128xf32>
      %c5_28 = arith.constant 5 : index
      %c0_29 = arith.constant 0 : index
      %91 = vector.load %arg10[%c5_28, %c0_29] : memref<8x128xf32, #tpu.memory_space<vmem>>, vector<3x128xf32>
      tpu.vector_store %arg10[%c5_28, %c0_29], %90 {strides = array<i32>} : memref<8x128xf32, #tpu.memory_space<vmem>>, vector<3x128xf32>,
      %cst_30 = arith.constant 0.000000e+00 : f32
      %92 = vector.broadcast %cst_30 : f32 to vector<8x128xf32>
      %c0_31 = arith.constant 0 : index
      %c0_32 = arith.constant 0 : index
      %93 = vector.load %arg11[%c0_31, %c0_32] : memref<8x128xf32, #tpu.memory_space<vmem>>, vector<8x128xf32>
      tpu.vector_store %arg11[%c0_31, %c0_32], %92 {strides = array<i32>} : memref<8x128xf32, #tpu.memory_space<vmem>>, vector<8x128xf32>,
      %cst_33 = arith.constant -2.000000e+00 : f32
      %94 = vector.broadcast %cst_33 : f32 to vector<1x128xf32>
      %95 = arith.mulf %94, %9 : vector<1x128xf32>
      %c0_34 = arith.constant 0 : index
      %c0_35 = arith.constant 0 : index
      %96 = vector.load %arg11[%c0_34, %c0_35] : memref<8x128xf32, #tpu.memory_space<vmem>>, vector<1x128xf32>
      tpu.vector_store %arg11[%c0_34, %c0_35], %95 {strides = array<i32>} : memref<8x128xf32, #tpu.memory_space<vmem>>, vector<1x128xf32>,
      %cst_36 = arith.constant -2.000000e+00 : f32
      %97 = vector.broadcast %cst_36 : f32 to vector<1x128xf32>
      %98 = arith.mulf %97, %10 : vector<1x128xf32>
      %c1_37 = arith.constant 1 : index
      %c0_38 = arith.constant 0 : index
      %99 = vector.load %arg11[%c1_37, %c0_38] : memref<8x128xf32, #tpu.memory_space<vmem>>, vector<1x128xf32>
      tpu.vector_store %arg11[%c1_37, %c0_38], %98 {strides = array<i32>} : memref<8x128xf32, #tpu.memory_space<vmem>>, vector<1x128xf32>,
      %cst_39 = arith.constant -2.000000e+00 : f32
      %100 = vector.broadcast %cst_39 : f32 to vector<1x128xf32>
      %101 = arith.mulf %100, %11 : vector<1x128xf32>
      %c2_40 = arith.constant 2 : index
      %c0_41 = arith.constant 0 : index
      %102 = vector.load %arg11[%c2_40, %c0_41] : memref<8x128xf32, #tpu.memory_space<vmem>>, vector<1x128xf32>
      tpu.vector_store %arg11[%c2_40, %c0_41], %101 {strides = array<i32>} : memref<8x128xf32, #tpu.memory_space<vmem>>, vector<1x128xf32>,
      %cst_42 = arith.constant 1.000000e+00 : f32
      %103 = vector.broadcast %cst_42 : f32 to vector<1x128xf32>
      %c3_43 = arith.constant 3 : index
      %c0_44 = arith.constant 0 : index
      %104 = vector.load %arg11[%c3_43, %c0_44] : memref<8x128xf32, #tpu.memory_space<vmem>>, vector<1x128xf32>
      tpu.vector_store %arg11[%c3_43, %c0_44], %103 {strides = array<i32>} : memref<8x128xf32, #tpu.memory_space<vmem>>, vector<1x128xf32>,
      %cst_45 = arith.constant 1.000000e+30 : f32
      %105 = vector.broadcast %cst_45 : f32 to vector<1x128xf32>
      %c4_46 = arith.constant 4 : index
      %c0_47 = arith.constant 0 : index
      %106 = vector.load %arg11[%c4_46, %c0_47] : memref<8x128xf32, #tpu.memory_space<vmem>>, vector<1x128xf32>
      tpu.vector_store %arg11[%c4_46, %c0_47], %105 {strides = array<i32>} : memref<8x128xf32, #tpu.memory_space<vmem>>, vector<1x128xf32>,
      %107 = arith.mulf %9, %9 : vector<1x128xf32>
      %108 = arith.mulf %10, %10 : vector<1x128xf32>
      %109 = arith.addf %107, %108 : vector<1x128xf32>
      %110 = arith.mulf %11, %11 : vector<1x128xf32>
      %111 = arith.addf %109, %110 : vector<1x128xf32>
      %c4_48 = arith.constant 4 : index
      %c0_49 = arith.constant 0 : index
      %112 = vector.load %arg11[%c4_48, %c0_49] : memref<8x128xf32, #tpu.memory_space<vmem>>, vector<1x128xf32>
      tpu.vector_store %arg11[%c4_48, %c0_49], %111 {strides = array<i32>} : memref<8x128xf32, #tpu.memory_space<vmem>>, vector<1x128xf32>,
      %c0_50 = arith.constant 0 : index
      %c0_51 = arith.constant 0 : index
      %113 = vector.load %arg11[%c0_50, %c0_51] : memref<8x128xf32, #tpu.memory_space<vmem>>, vector<8x128xf32>
      %c0_52 = arith.constant 0 : index
      %c0_53 = arith.constant 0 : index
      %114 = vector.load %arg10[%c0_52, %c0_53] : memref<8x128xf32, #tpu.memory_space<vmem>>, vector<8x128xf32>
      %cst_54 = arith.constant dense<0.000000e+00> : vector<128x128xf32>
      %115 = tpu.matmul %113, %114, %cst_54 {dimension_numbers = #tpu.dot_dimension_numbers<[0], [0], [1], [1], [0, 1, 1, 1], [], []>} : vector<8x128xf32>, vector<8x128xf32>, vector<128x128xf32> -> vector<128x128xf32>
      %cst_55 = arith.constant dense<0x7F800000> : vector<128xf32>
      %116 = vector.multi_reduction <minimumf>, %115, %cst_55 [0] : vector<128x128xf32> to vector<128xf32>
      %117 = vector.shape_cast %116 : vector<128xf32> to vector<1x128xf32>
      %c0_56 = arith.constant 0 : index
      %c0_57 = arith.constant 0 : index
      %118 = vector.load %arg8[%c0_56, %c0_57] : memref<1x128xf32, #tpu.memory_space<vmem>>, vector<1x128xf32>
      tpu.vector_store %arg8[%c0_56, %c0_57], %117 {strides = array<i32>} : memref<1x128xf32, #tpu.memory_space<vmem>>, vector<1x128xf32>,
    } else {
    }
    %c0_11 = arith.constant 0 : index
    %c0_12 = arith.constant 0 : index
    %74 = vector.load %arg8[%c0_11, %c0_12] : memref<1x128xf32, #tpu.memory_space<vmem>>, vector<1x128xf32>
    %c0_13 = arith.constant 0 : index
    %c0_14 = arith.constant 0 : index
    %75 = vector.load %arg9[%c0_13, %c0_14] : memref<1x128xf32, #tpu.memory_space<vmem>>, vector<1x128xf32>
    tpu.vector_store %arg9[%c0_13, %c0_14], %74 {strides = array<i32>} : memref<1x128xf32, #tpu.memory_space<vmem>>, vector<1x128xf32>,
    %c0_i32_15 = arith.constant 0 : i32
    %76 = arith.cmpi eq, %arg1, %c0_i32_15 : i32
    %77 = arith.extui %76 : i1 to i32
    %c0_i32_16 = arith.constant 0 : i32
    %78 = arith.cmpi ne, %77, %c0_i32_16 : i32
    scf.if %78 {
      %c0_17 = arith.constant 0 : index
      %c0_18 = arith.constant 0 : index
      %79 = vector.load %arg9[%c0_17, %c0_18] : memref<1x128xf32, #tpu.memory_space<vmem>>, vector<1x128xf32>
      %cst = arith.constant 0.000000e+00 : f32
      %80 = vector.broadcast %cst : f32 to vector<1x128xf32>
      %81 = arith.maximumf %79, %80 : vector<1x128xf32>
      %82 = math.sqrt %81 : vector<1x128xf32>
      %cst_19 = arith.constant dense<0.000000e+00> : vector<1xf32>
      %83 = vector.multi_reduction <add>, %82, %cst_19 [1] : vector<1x128xf32> to vector<1xf32>
      %84 = vector.shape_cast %83 : vector<1xf32> to vector<1x1xf32>
      %cst_20 = arith.constant 7.812500e-03 : f32
      %85 = vector.broadcast %cst_20 : f32 to vector<1x1xf32>
      %86 = arith.mulf %84, %85 : vector<1x1xf32>
      %c0_21 = arith.constant 0 : index
      %c0_22 = arith.constant 0 : index
      %c0_23 = arith.constant 0 : index
      %87 = vector.load %arg7[%c0_21, %c0_22, %c0_23] : memref<1x1x1xf32, #tpu.memory_space<vmem>>, vector<1x1x1xf32>
      %88 = vector.shape_cast %87 : vector<1x1x1xf32> to vector<1x1xf32>
      %89 = vector.shape_cast %86 : vector<1x1xf32> to vector<1x1x1xf32>
      tpu.vector_store %arg7[%c0_21, %c0_22, %c0_23], %89 {strides = array<i32>} : memref<1x1x1xf32, #tpu.memory_space<vmem>>, vector<1x1x1xf32>,
    } else {
    }
    return
  }
  func.func @transform_0(%arg0: i32, %arg1: i32, %arg2: memref<2xi32, #tpu.memory_space<smem>>) -> (i32, i32) {
    %c0_i32 = arith.constant 0 : i32
    %c0_i32_0 = arith.constant 0 : i32
    %c0_i32_1 = arith.constant 0 : i32
    return %c0_i32, %c0_i32_0 : i32, i32
  }
  func.func @transform_1(%arg0: i32, %arg1: i32, %arg2: memref<2xi32, #tpu.memory_space<smem>>) -> (i32, i32) {
    %c0_i32 = arith.constant 0 : i32
    %c0_i32_0 = arith.constant 0 : i32
    %c0_i32_1 = arith.constant 0 : i32
    return %c0_i32, %c0_i32_0 : i32, i32
  }
  func.func @transform_2(%arg0: i32, %arg1: i32, %arg2: memref<2xi32, #tpu.memory_space<smem>>) -> (i32, i32, i32) {
    %c1_i32 = arith.constant 1 : i32
    %0 = arith.muli %arg0, %c1_i32 : i32
    %1 = arith.addi %0, %arg1 : i32
    %c0_i32 = arith.constant 0 : i32
    %c0_i32_0 = arith.constant 0 : i32
    %c0_i32_1 = arith.constant 0 : i32
    return %1, %c0_i32, %c0_i32_0 : i32, i32, i32
  }
  func.func @transform_3(%arg0: i32, %arg1: i32, %arg2: memref<2xi32, #tpu.memory_space<smem>>) -> (i32, i32, i32) {
    %c1_i32 = arith.constant 1 : i32
    %0 = arith.muli %arg0, %c1_i32 : i32
    %1 = arith.addi %0, %arg1 : i32
    %c0_i32 = arith.constant 0 : i32
    %c0_i32_0 = arith.constant 0 : i32
    %c0_i32_1 = arith.constant 0 : i32
    return %1, %c0_i32, %c0_i32_0 : i32, i32, i32
  }
  func.func @transform_4(%arg0: i32, %arg1: i32, %arg2: memref<2xi32, #tpu.memory_space<smem>>) -> (i32, i32, i32) {
    %c0_i32 = arith.constant 0 : i32
    %c0_i32_0 = arith.constant 0 : i32
    %c0_i32_1 = arith.constant 0 : i32
    return %arg0, %c0_i32, %c0_i32_0 : i32, i32, i32
  }
}

</mosaic_0001>

<bundles_post_ra>
// kernel: tpu_custom_call.1
= control target key start
LH: loop header
LB: loop body
LE: loop exit
PB: predicated region body
PF: predicated region fallthrough
CT: control target
= control target key end

     0   :  { %s1135_s0 = inlined_call_operand.vmem [shape: s32[2], index: 0, kind: input, shape index: {}]   ;;  %s1136_s1 = inlined_call_operand.vmem [shape: f32[2,9], index: 1, kind: input, shape index: {}]   ;;  %s1137_s2 = inlined_call_operand.vmem [shape: f32[2,3], index: 2, kind: input, shape index: {}]   ;;  %s1138_s3 = inlined_call_operand.vmem [shape: f32[2,3,128], index: 3, kind: input, shape index: {}]   ;;  %s1139_s4 = inlined_call_operand.vmem [shape: f32[2,3,128], index: 4, kind: input, shape index: {}]   ;;  %s1140_s5 = inlined_call_operand.vmem [shape: f32[2,1,1], index: 5, kind: output, shape index: {}]  }
   0x1   :  { %s10_s20 = sshll.u32 %s1135_s0, 4  ;;  %s11_s20 = int_to_ptr.vmem [resolvable:$true] %s10_s20 }
   0x2   :  { %s880_s21 = scalar_lea.vmem %s11_s20, 16  ;;  %p885_p1 = scmp.lt.s32.totalorder %s11_s20, %s11_s20 }
   0x3   :  { %p881_p0 = scmp.ne.s32.totalorder %s11_s20, %s880_s21  ;;  %p886_p2 = scmp.lt.s32.totalorder %s880_s21, %s880_s21 }
   0x5   :  { %p887_p3 = por %p886_p2, %p885_p1 }
   0x7   :  { %p888_p4 = pnand %p887_p3, %p881_p0 }
   0x9   :  { %891 = shalt.err (!%p888_p4)  }
   0xa   :  { %s956_s22 = smov [#allocation7]  }
   0xb   :  { %13 = dma.vmem_to_smem %s11_s20, 16, %s956_s22, [#allocation6] }
   0xc   :  { %934 = dma.done.wait [#allocation6], 16 }
   0xd   :  { %935 = vsyncadd [#allocation6], 4294967280 }
   0xe   :  { %15 = sfence }
   0xf   :  { %16 = vsyncpa [#allocation9], 0 }
  0x10   :  { %17 = vsyncpa [#allocation11], 0  ;;  %s995_s23 = smov 0   ;;  %s997_s24 = smov 0  }
  0x11   :  { %s999_s0 = smov 0  }
  0x12 LB: > { %s752_s25 = sadd.s32 4294967295, %s954_s0   ;;  %s35_s26 = sadd.s32 1, %s950_s24  ;;  %s954_s0 = sphi %s999_s0, %s23_s0   ;;  %s950_s24 = sphi %s997_s24, %s1150_s24   ;;  %s946_s23 = sphi %s995_s23, %s1149_s23  }
  0x13   : > { %p37_p5 = scmp.ge.s32.totalorder %s35_s26, 2  ;;  %p754_p6 = scmp.ge.s32.totalorder %s954_s0, 1 }
  0x14   : > { %p164_p7 = scmp.lt.s32.totalorder %s954_s0, 3  ;;  %p1020_p9 = scmp.eq.s32.totalorder %s752_s25, 0 }
  0x15   : > { %s1152_s26 = smov (%p37_p5, %s35_s26), 0  ;;  %s177_s6 = sshll.u32 %s1136_s1, 4  ;;  %s178_s6 = int_to_ptr.vmem [resolvable:$true] %s177_s6 }
  0x16   : > { %p1016_p8 = pnand %p754_p6, %p164_p7  ;;  %s188_s9 = sshll.u32 %s1137_s2, 4  ;;  %s189_s9 = int_to_ptr.vmem [resolvable:$true] %s188_s9 }
  0x17   : > { %s1145_s28 = scalar_select %p1020_p9, 1, 0 }
  0x18   : > { %s1144_s27 = scalar_select %p1016_p8, 1, 0 }
  0x19   : > { %p837_p10 = pneg %p1016_p8  ;;  %s892_s11 = scalar_lea.vmem %s178_s6, 32 }
  0x1a   : > { %p893_p12 = scmp.ne.s32.totalorder %s178_s6, %s892_s11  ;;  %p900_p2 = scmp.lt.s32.totalorder %s178_s6, %s178_s6 }
  0x1b   : > { %p1034_p11 = pnand %p1020_p9, %p837_p10  ;;  %p901_p3 = scmp.lt.s32.totalorder %s892_s11, %s892_s11 }
  0x1d   : > { %p894_p13 = pneg %p1034_p11  ;;  %p902_p4 = por %p901_p3, %p900_p2 }
  0x1f   : > { %p895_p0 = pnand %p894_p13, %p893_p12 }
  0x21   : > { %p896_p1 = pneg %p895_p0 }
  0x23   : > { %p903_p5 = pnand %p902_p4, %p896_p1 }
  0x25   : > { %906 = shalt.err (!%p903_p5)
}
  0x26   : > { %s957_s12 = smov [#allocation8]   ;;  %s907_s13 = scalar_lea.vmem %s189_s9, 32 }
  0x27   : > { %840 = dma.vmem_to_smem (!%p1034_p11), %s178_s6, 32, %s957_s12, [#allocation9]  }
  0x28   : > { %p908_p6 = scmp.ne.s32.totalorder %s189_s9, %s907_s13  ;;  %p915_p9 = scmp.lt.s32.totalorder %s189_s9, %s189_s9 }
  0x29   : > { %p916_p8 = scmp.lt.s32.totalorder %s907_s13, %s907_s13 }
  0x2a   : > { %p910_p7 = pnand %p908_p6, %p894_p13 }
  0x2b   : > { %p917_p12 = por %p916_p8, %p915_p9 }
  0x2c   : > { %p911_p10 = pneg %p910_p7 }
  0x2e   : > { %p918_p0 = pnand %p917_p12, %p911_p10 }
  0x30   : > { %921 = shalt.err (!%p918_p0)
}
  0x31   : > { %s958_s14 = smov [#allocation10]   ;;  %p1147_p1 = scmp.ne.s32.totalorder %s1144_s27, 0 }
  0x32   : > { %843 = dma.vmem_to_smem (!%p1034_p11), %s189_s9, 32, %s958_s14, [#allocation11]  }
  0x33   : > { %219 = sbr.rel (%p1147_p1) target bundleno = 716 (0x2cc), region = 36  ;;  %p1148_p2 = scmp.ne.s32.totalorder (!%p1147_p1), %s1145_s28, 0 }
  0x3a   : > { %937 = dma.done.wait (%p1148_p2), [#allocation9], 32  }
  0x3b   : > { %939 = vsyncadd (%p1148_p2), [#allocation9], 4294967264 }
  0x3c   : > { %941 = dma.done.wait (%p1148_p2), [#allocation11], 32  }
  0x3d   : > { %943 = vsyncadd (%p1148_p2), [#allocation11], 4294967264 }
  0x3e   : > { %229 = sfence }
  0x3f   : > { %p254_p8 = scmp.lt.s32.totalorder %s946_s23, 1  ;;  %s1056_s15 = sshll.u32 %s946_s23, 7 }
  0x40   : > { %s272_s16 = sld [smem:[#allocation8 + %s1056_s15]]  ;;  %s275_s17 = sadd.s32 1, %s1056_s15 }
  0x41   : > { %s1061_s18 = scalar_select %p254_p8, %s946_s23, 1 }
  0x42   : > { %s276_s19 = sld [smem:[#allocation8 + %s275_s17]]  ;;  %s283_s20 = sadd.s32 2, %s1056_s15 }
  0x43   : > { %s761_s21 = sshll.u32 %s1061_s18, 2  ;;  %s267_s27 = scalar_lea.vmem %s1140_s5, %s1061_s18 }
  0x44   : > { %s257_s30 = scalar_lea.vmem %s1138_s3, %s761_s21  ;;  %s263_s8 = scalar_lea.vmem %s1139_s4, %s761_s21 }
  0x45   : > { %v1075_v0 = vld [vmem:[%s263_s8] sm:$0x7]  ;;  %s284_s9 = sld [smem:[#allocation8 + %s283_s20]]  ;;  %s294_s11 = sadd.s32 3, %s1056_s15 }
  0x46   : > { %s1080_s10 = sld [smem:[#allocation10 + %s1056_s15]]  ;;  %v269_v1 = vld [vmem:[%s257_s30] sm:$0x7]  ;;  %v273_v2 = vstv %s272_s16  ;;  %s298_s12 = sadd.s32 4, %s1056_s15 }
  0x47   : > { %s295_s13 = sld [smem:[#allocation8 + %s294_s11]]  ;;  %s306_s22 = sadd.s32 5, %s1056_s15  ;;  %v274_v4 = vmul.f32 %v273_v2, %v269_v1 }
  0x48   : > { %s299_s14 = sld [smem:[#allocation8 + %s298_s12]]  ;;  %v277_v3 = vstv %s276_s19  ;;  %s317_s28 = sadd.s32 6, %s1056_s15 }
  0x49   : > { %s1085_s25 = sld [smem:[#allocation10 + %s275_s17]]  ;;  %v278_v5 = vmul.f32 %v277_v3, %v269_v1  ;;  %s321_s6 = sadd.s32 7, %s1056_s15 }
  0x4a   : > { %s307_s21 = sld [smem:[#allocation8 + %s306_s22]]  ;;  %s329_s30 = sadd.s32 8, %s1056_s15 }
  0x4b   : > { %s318_s29 = sld [smem:[#allocation8 + %s317_s28]]  ;;  %v280_v6 = vrot.slane %v278_v5, 1  ;;  %v285_v7 = vstv %s284_s9 }
  0x4c   : > { %s322_s16 = sld [smem:[#allocation8 + %s321_s6]]  ;;  %v286_v8 = vmul.f32 %v285_v7, %v269_v1  ;;  %v292_v15 = vstv %s1080_s10 }
  0x4d   : > { %s330_s7 = sld [smem:[#allocation8 + %s329_s30]]  ;;  %v282_v9 = vadd.f32 %v280_v6, %v274_v4  ;;  %v296_v10 = vstv %s295_s13 }
  0x4e   : > { %v300_v11 = vstv %s299_s14  ;;  %s1091_s17 = sld [smem:[#allocation7 + %s946_s23]]  ;;  %v288_v12 = vrot.slane %v286_v8, 2  ;;  %v297_v13 = vmul.f32 %v296_v10, %v269_v1 }
  0x4f   : > { %v301_v14 = vmul.f32 %v300_v11, %v269_v1  ;;  %s337_s19 = sld [smem:[#allocation10 + %s283_s20]]  ;;  %v315_v27 = vstv %s1085_s25 }
  0x50   : > { %v308_v16 = vstv %s307_s21  ;;  %v290_v17 = vadd.f32 %v288_v12, %v282_v9 }
  0x51   : > { %v303_v18 = vrot.slane %v301_v14, 1  ;;  %v309_v19 = vmul.f32 %v308_v16, %v269_v1  ;;  %v319_v20 = vstv %s318_s29 }
  0x52   : > { %v320_v21 = vmul.f32 %v319_v20, %v269_v1  ;;  %v323_v22 = vstv %s322_s16  ;;  %v293_v23 = vadd.f32 %v292_v15, %v290_v17 }
  0x53   : > { %v305_v24 = vadd.f32 %v303_v18, %v297_v13  ;;  %v311_v25 = vrot.slane %v309_v19, 2  ;;  %v324_v26 = vmul.f32 %v323_v22, %v269_v1  ;;  %v331_v28 = vstv %s330_s7 }
  0x54   : > { %v332_v31 = vmul.f32 %v331_v28, %v269_v1  ;;  %p764_p9 = scmp.gt.s32.totalorder %s1091_s17, 0 }
  0x55   : > { %v313_v29 = vadd.f32 %v311_v25, %v305_v24  ;;  %v326_v30 = vrot.slane %v324_v26, 1  ;;  %v338_v35 = vstv %s337_s19  ;;  %v346_v38 = vsub.f32 (!%p764_p9), %v293_v23, %v1075_v0 }
  0x56   : > { %v334_v34 = vrot.slane %v332_v31, 2  ;;  %345 = sbr.rel (%p764_p9) target bundleno = 100 (0x64), region = 48  ;;  %v348_v39 = vrot.slane (!%p764_p9), %v1075_v0, 1  ;;  %v351_v40 = vrot.slane (!%p764_p9), %v1075_v0, 2 }
  0x57   : > { %v316_v32 = vadd.f32 %v315_v27, %v313_v29  ;;  %v328_v33 = vadd.f32 %v326_v30, %v320_v21  ;;  %v354_v43 = vmul.f32 (!%p764_p9), %v346_v38, %v346_v38 }
  0x59   : > { %v336_v36 = vadd.f32 %v334_v34, %v328_v33  ;;  %v350_v41 = vsub.f32 (!%p764_p9), %v316_v32, %v348_v39 }
  0x5b   : > { %v339_v37 = vadd.f32 %v338_v35, %v336_v36  ;;  %v355_v44 = vmul.f32 (!%p764_p9), %v350_v41, %v350_v41 }
  0x5d   : > { %v353_v42 = vsub.f32 %v339_v37, %v351_v40  ;;  %v356_v46 = vadd.f32 %v355_v44, %v354_v43 }
  0x5f   : > { %v357_v45 = vmul.f32 %v353_v42, %v353_v42 }
  0x61   : > { %v358_v47 = vadd.f32 %v357_v45, %v356_v46 }
  0x63   : > { %359 = vst [vmem:[#allocation2] sm:$0x1] %v358_v47 }
  0x64 PF: > { %p765_p11 = scmp.le.s32.totalorder %s1091_s17, 0 }
  0x65   : > { %v375_v48 = vmul.f32 (!%p765_p11), -2.0, %v1075_v0  ;;  %363 = vst [vmem:[#allocation4] sm:$0x1] (!%p765_p11), %v293_v23  ;;  %364 = vst [vmem:[#allocation4 + $0x1] sm:$0x1] (!%p765_p11), %v316_v32  ;;  %v959_v49 = vmov (!%p765_p11), 0.0   ;;  %v381_v50 = vmul.f32 (!%p765_p11), %v1075_v0, %v1075_v0  ;;  %v366_v56 = vmul.f32 (!%p765_p11), %v293_v23, %v293_v23 }
  0x66   : > { %362 = sbr.rel (%p765_p11) target bundleno = 538 (0x21a), region = 52  ;;  %365 = vst [vmem:[#allocation4 + $0x2] sm:$0x1] (!%p765_p11), %v339_v37  ;;  %373 = vst [vmem:[#allocation4 + $0x5] sm:$0x7] (!%p765_p11), %v959_v49  ;;  %v960_v51 = vmov (!%p765_p11), 1.0   ;;  %v367_v57 = vmul.f32 (!%p765_p11), %v316_v32, %v316_v32  ;;  %v369_v60 = vmul.f32 (!%p765_p11), %v339_v37, %v339_v37 }
  0x67   : > { %374 = vst [vmem:[#allocation5] sm:$0xff] (!%p765_p11), %v959_v49  ;;  %372 = vst [vmem:[#allocation4 + $0x4] sm:$0x1] (!%p765_p11), %v960_v51  ;;  %v961_v52 = vmov (!%p765_p11), 1e+30   ;;  %v383_v53 = vrot.slane (!%p765_p11), %v381_v50, 1 }
  0x68   : > { %376 = vst [vmem:[#allocation5] sm:$0x3] (!%p765_p11), %v375_v48   ;;  %378 = vst [vmem:[#allocation5] sm:$0x4] (!%p765_p11), %v375_v48  ;;  %v386_v54 = vrot.slane (!%p765_p11), %v381_v50, 2  ;;  %v368_v59 = vadd.f32 (!%p765_p11), %v367_v57, %v366_v56  ;;  %vm424_vm0 = vcmask (!%p765_p11), 64512  }
  0x69   : > { %379 = vst [vmem:[#allocation5 + $0x3] sm:$0x1] (!%p765_p11), %v960_v51  ;;  %380 = vst [vmem:[#allocation5 + $0x4] sm:$0x1] (!%p765_p11), %v961_v52  ;;  %v385_v55 = vadd.f32 (!%p765_p11), %v383_v53, %v381_v50 }
  0x6a   : > { %v370_v61 = vadd.f32 (!%p765_p11), %v369_v60, %v368_v59 }
  0x6b   : > { %v388_v58 = vadd.f32 (!%p765_p11), %v386_v54, %v385_v55 }
  0x6c   : > { %371 = vst [vmem:[#allocation4 + $0x3] sm:$0x1] (!%p765_p11), %v370_v61 }
  0x6d   : > { %389 = vst [vmem:[#allocation5 + $0x4] sm:$0x1] %v388_v58 }
  0x73   : > { %v391_v63 = vld [vmem:[#allocation4] sm:$0xff] }
  0x74   : > { %v390_v62 = vld [vmem:[#allocation5] sm:$0xff]  ;;  %801 = vmatprep.subr.mxu0 %v391_v63  ;;  %827 = vmatprep.subr.mxu1 %v391_v63 }
  0x75   : > { %392 = vxpose.xlu0.b32.start.end [1/1] (short) %v390_v62, 128  ;;  %802 = vmatpush3.msra.mxu0 %v391_v63 }
  0x76   : > { %828 = vmatpush3.msra.mxu1 %v391_v63 }
  0xf5   : > { %v408_v0 = vpop.trf.xlu0 }
  0xf6   : > { %803 = vmatprep.mubr.msk.f32.mxu0 %vm424_vm0, %v408_v0 }
  0xf9   : > { %v409_v1 = vpop.trf.xlu0 }
  0xfa   : > { %804 = vmatmul.mubr.msk.f32.vlgmr.msra.gmra.mrb[0].mxu0 %vm424_vm0, %v409_v1 }
  0xfd   : > { %v410_v2 = vpop.trf.xlu0 }
  0xfe   : > { %806 = vmatprep.mubr.msk.f32.mxu0 %vm424_vm0, %v410_v2 }
 0x101   : > { %v411_v3 = vpop.trf.xlu0 }
 0x102   : > { %807 = vmatmul.mubr.msk.f32.gmra.mrb[2].mxu0 %vm424_vm0, %v411_v3 }
 0x105   : > { %v412_v4 = vpop.trf.xlu0 }
 0x106   : > { %809 = vmatprep.mubr.msk.f32.mxu0 %vm424_vm0, %v412_v4 }
 0x109   : > { %v413_v5 = vpop.trf.xlu0 }
 0x10a   : > { %810 = vmatmul.mubr.msk.f32.gmra.mrb[4].mxu0 %vm424_vm0, %v413_v5 }
 0x10d   : > { %v414_v6 = vpop.trf.xlu0 }
 0x10e   : > { %812 = vmatprep.mubr.msk.f32.mxu0 %vm424_vm0, %v414_v6 }
 0x111   : > { %v415_v7 = vpop.trf.xlu0 }
 0x112   : > { %813 = vmatmul.mubr.msk.f32.gmra.mrb[6].mxu0 %vm424_vm0, %v415_v7 }
 0x115   : > { %v416_v8 = vpop.trf.xlu0 }
 0x116   : > { %815 = vmatprep.mubr.msk.f32.mxu1 %vm424_vm0, %v416_v8 }
 0x119   : > { %v417_v9 = vpop.trf.xlu0 }
 0x11a   : > { %816 = vmatmul.mubr.msk.f32.vlgmr.msra.gmra.mrb[0].mxu1 %vm424_vm0, %v417_v9 }
 0x11d   : > { %v418_v10 = vpop.trf.xlu0 }
 0x11e   : > { %818 = vmatprep.mubr.msk.f32.mxu1 %vm424_vm0, %v418_v10 }
 0x121   : > { %v419_v11 = vpop.trf.xlu0 }
 0x122   : > { %819 = vmatmul.mubr.msk.f32.gmra.mrb[2].mxu1 %vm424_vm0, %v419_v11 }
 0x125   : > { %v420_v12 = vpop.trf.xlu0 }
 0x126   : > { %821 = vmatprep.mubr.msk.f32.mxu1 %vm424_vm0, %v420_v12 }
 0x129   : > { %v421_v13 = vpop.trf.xlu0 }
 0x12a   : > { %822 = vmatmul.mubr.msk.f32.gmra.mrb[4].mxu1 %vm424_vm0, %v421_v13 }
 0x12d   : > { %v422_v14 = vpop.trf.xlu0 }
 0x12e   : > { %824 = vmatprep.mubr.msk.f32.mxu1 %vm424_vm0, %v422_v14 }
 0x131   : > { %v423_v15 = vpop.trf.xlu0 }
 0x132   : > { %825 = vmatmul.mubr.msk.f32.gmra.mrb[6].mxu1 %vm424_vm0, %v423_v15 }
 0x1cd   : > { %v805_v16 = vpop.f32.mrb[0].mxu0 }
 0x1ce   : > { %v539_v17 = vpop.f32.mrb[1].mxu0 }
 0x1d5   : > { %v808_v18 = vpop.f32.mrb[2].mxu0 }
 0x1d6   : > { %v549_v19 = vpop.f32.mrb[3].mxu0 }
 0x1dd   : > { %v811_v20 = vpop.f32.mrb[4].mxu0 }
 0x1de   : > { %v619_v21 = vmin.f32 %v805_v16, %v811_v20  ;;  %v559_v22 = vpop.f32.mrb[5].mxu0 }
 0x1df   : > { %v618_v23 = vmin.f32 %v539_v17, %v559_v22 }
 0x1e5   : > { %v814_v24 = vpop.f32.mrb[6].mxu0 }
 0x1e6   : > { %v621_v25 = vmin.f32 %v808_v18, %v814_v24  ;;  %v569_v26 = vpop.f32.mrb[7].mxu0 }
 0x1e7   : > { %v620_v27 = vmin.f32 %v549_v19, %v569_v26 }
 0x1ed   : > { %v817_v28 = vpop.f32.mrb[0].mxu1 }
 0x1ee   : > { %v623_v29 = vmin.f32 %v619_v21, %v817_v28  ;;  %v579_v30 = vpop.f32.mrb[1].mxu1 }
 0x1ef   : > { %v622_v31 = vmin.f32 %v618_v23, %v579_v30 }
 0x1f5   : > { %v820_v32 = vpop.f32.mrb[2].mxu1 }
 0x1f6   : > { %v625_v33 = vmin.f32 %v621_v25, %v820_v32  ;;  %v589_v34 = vpop.f32.mrb[3].mxu1 }
 0x1f7   : > { %v624_v35 = vmin.f32 %v620_v27, %v589_v34 }
 0x1fd   : > { %v823_v36 = vpop.f32.mrb[4].mxu1 }
 0x1fe   : > { %v627_v37 = vmin.f32 %v623_v29, %v823_v36  ;;  %v599_v38 = vpop.f32.mrb[5].mxu1 }
 0x1ff   : > { %v626_v39 = vmin.f32 %v622_v31, %v599_v38 }
 0x201   : > { %v630_v40 = vmin.f32 %v626_v39, %v627_v37 }
 0x205   : > { %v826_v41 = vpop.f32.mrb[6].mxu1 }
 0x206   : > { %v629_v42 = vmin.f32 %v625_v33, %v826_v41  ;;  %v609_v43 = vpop.f32.mrb[7].mxu1 }
 0x207   : > { %v628_v44 = vmin.f32 %v624_v35, %v609_v43 }
 0x209   : > { %v631_v45 = vmin.f32 %v628_v44, %v629_v42 }
 0x20b   : > { %v632_v46 = vmin.f32 %v630_v40, %v631_v45 }
 0x20d   : > { %v633_v47 = vrot.slane %v632_v46, 4 }
 0x20f   : > { %v634_v48 = vmin.f32 %v632_v46, %v633_v47 }
 0x211   : > { %v635_v49 = vrot.slane %v634_v48, 2 }
 0x213   : > { %v636_v50 = vmin.f32 %v634_v48, %v635_v49 }
 0x215   : > { %v637_v51 = vrot.slane %v636_v50, 1 }
 0x217   : > { %v638_v52 = vmin.f32 %v636_v50, %v637_v51 }
 0x219   : > { %639 = vst [vmem:[#allocation2] sm:$0x1] %v638_v52 }
 0x21a PF: > { %vm655_vm3 = vcmask 1040384   ;;  %vm660_vm4 = vcmask 0  }
 0x220   : > { %v640_v53 = vld [vmem:[#allocation2] sm:$0x1] }
 0x221   : > { %641 = vst [vmem:[#allocation3] sm:$0x1] %v640_v53 }
 0x228   : > { %v646_v54 = vld [vmem:[#allocation3] sm:$0x1] }
 0x229   : > { %v647_v55 = vmax.f32 %v646_v54, 0.0 }
 0x22b   : > { %878 = vrsqrt.f32 %v647_v55  ;;  %vm650_vm1 = vcmp.eq.f32.partialorder %v647_v55, inf  ;;  %v653_v57 = vand.u32 2147483648, %v647_v55  ;;  %vm652_vm2 = vcmp.eq.f32.partialorder %v647_v55, 0.0 }
 0x235   : > { %v879_v56 = vpop.eup %878 }
 0x236   : > { %v649_v58 = vmul.f32 %v879_v56, %v647_v55 }
 0x238   : > { %v651_v59 = vsel %vm650_vm1, %v647_v55, %v649_v58 }
 0x239   : > { %v654_v60 = vsel %vm652_vm2, %v653_v57, %v651_v59 }
 0x23a   : > { %v656_v61 = vsel %vm655_vm3, %v654_v60, 0.0 }
 0x23b   : > { %657 = vadd.xlane.f32.xlu0 %v656_v61 }
 0x2c8   : > { %v658_v62 = vpop.xlane.xlu0 %657 }
 0x2c9   : > { %v659_v63 = vmul.f32 0.0078125, %v658_v62 }
 0x2cb   : > { %661 = vst.msk [vmem:[%s267_s27] sm:$0x1] %vm660_vm4, %v659_v63 }
 0x2cc PF: > { %s23_s0 = sadd.s32 1, %s954_s0   ;;  %s1149_s23 = smov %s950_s24 }
 0x2cd   : > { %p20_p13 = scmp.ge.s32.totalorder %s23_s0, 4   ;;  %s1150_s24 = smov %s1152_s26 }
 0x2cf   :  { %22 = sbr.rel (!%p20_p13) target bundleno = 18 (0x12), region = 90 }
 0x2d6   :  { %679 = vsyncpa [#allocation9], 1 }
 0x2d7   :  { %681 = vsyncpa [#allocation9 + $0x1], 1 }
 0x2d8   :  { %682 = vsyncpa [#allocation11], 1 }

</bundles_post_ra>
